<compile_context>
chip_gen: v5e
topology: v5e:2x2
jax: 0.10.0
libtpu: 0.0.40
codegen_flags: <defaults>
</compile_context>

<pallas_src>
import jax
import jax.numpy as jnp
from jax.experimental import pallas as pl
from jax.experimental.pallas import tpu as pltpu


def _inverse_rotate_kernel(x_ref, w_ref, o_ref):
    # o = x @ W.T, written as a contraction over W's second axis so the MXU
    # consumes W as-is (avoids materializing an XLU transpose every grid step).
    o_ref[...] = jax.lax.dot_general(
        x_ref[...],
        w_ref[...],
        dimension_numbers=(((1,), (1,)), ((), ())),
        preferred_element_type=jnp.float32,
    ).astype(o_ref.dtype)


def _round_up(v, m):
    return ((v + m - 1) // m) * m


# Conservative VMEM budget that fits every generation (v7x has only 64 MiB physical).
_VMEM_BUDGET_BYTES = 48 * 1024 * 1024


def inverse_rotate(x, weight, *, block_m=512):
    """Pallas equivalent of InverseRotateLayer.forward: x @ weight.T."""
    orig_shape = x.shape
    n = weight.shape[0]
    assert weight.shape == (n, n)
    assert orig_shape[-1] == n

    x2d = x.reshape(-1, n)
    m = x2d.shape[0]
    itemsize = jnp.dtype(x.dtype).itemsize

    # Lane-dense output (multiple of 128 in the last dim) + sublane-aligned rows.
    n_p = _round_up(n, 128)
    m8 = _round_up(m, 8)

    # Weight is kept VMEM-resident; budget the rest for double-buffered x / out tiles.
    weight_bytes = 2 * n_p * n_p * itemsize  # conservative: assume 2 buffers
    if weight_bytes > _VMEM_BUDGET_BYTES:
        # TODO(synk): for very large hidden sizes (e.g. 4096 f32 on v7x's 64 MiB VMEM),
        # add an N/K-tiled accumulator variant instead of falling back to XLA.
        return jnp.matmul(x, weight.T)

    avail = _VMEM_BUDGET_BYTES - weight_bytes
    tm_cap = max(8, (avail // (4 * n_p * itemsize)) // 8 * 8)  # 2 bufs x (in + out)
    tm = _round_up(min(block_m, m8, tm_cap), 8)
    m_p = _round_up(m8, tm)

    x_pad = jnp.pad(x2d, ((0, m_p - m), (0, n_p - n)))
    w_pad = jnp.pad(weight, ((0, n_p - n), (0, n_p - n)))

    needed_bytes = weight_bytes + 4 * tm * n_p * itemsize
    vmem_limit = int(min(max(needed_bytes + (4 << 20), 32 << 20), 64 << 20))

    out = pl.pallas_call(
        _inverse_rotate_kernel,
        out_shape=jax.ShapeDtypeStruct((m_p, n_p), x.dtype),
        grid=(m_p // tm,),
        in_specs=[
            pl.BlockSpec((tm, n_p), lambda i: (i, 0)),    # streamed x tiles
            pl.BlockSpec((n_p, n_p), lambda i: (0, 0)),   # VMEM-resident weight
        ],
        out_specs=pl.BlockSpec((tm, n_p), lambda i: (i, 0)),
        compiler_params=pltpu.CompilerParams(
            dimension_semantics=("parallel",),            # M tiles are independent
            vmem_limit_bytes=vmem_limit,
        ),
        cost_estimate=pl.CostEstimate(
            flops=2 * m_p * n_p * n_p,
            bytes_accessed=(2 * m_p * n_p + n_p * n_p) * itemsize,
            transcendentals=0,
        ),
    )(x_pad, w_pad)

    return out[:m, :n].reshape(orig_shape)


if __name__ == "__main__":
    key = jax.random.PRNGKey(0)
    k_x, k_w = jax.random.split(key)

    batch, seq, hidden = 2, 8, 32

    # Deterministic "rotation" weight: orthogonalize a random matrix (mirrors
    # the orthogonal parametrization typically used for RotateLayer).
    w_raw = jax.random.normal(k_w, (hidden, hidden), dtype=jnp.float32)
    weight, _ = jnp.linalg.qr(w_raw)
    weight = weight.astype(jnp.float32)

    x = jax.random.normal(k_x, (batch, seq, hidden), dtype=jnp.float32)

    out = inverse_rotate(x, weight)
    out = jax.block_until_ready(out)

    # Reference check against plain JAX.
    ref = jnp.matmul(x, weight.T)
    assert out.shape == ref.shape
    assert jnp.allclose(out, ref, atol=1e-5, rtol=1e-5), "mismatch vs reference"

    print("KERNEL_OK")
</pallas_src>

<mosaic_0001>
module attributes {stable_mosaic.version = 11 : i64} {
  func.func @_inverse_rotate_kernel(%arg0: i32, %arg1: memref<16x128xf32, #tpu.memory_space<vmem>>, %arg2: memref<128x128xf32, #tpu.memory_space<vmem>>, %arg3: memref<16x128xf32, #tpu.memory_space<vmem>>) attributes {dimension_semantics = [#tpu.dimension_semantics<parallel>], iteration_bounds = array<i64: 1>, scalar_prefetch = 0 : i64, scratch_operands = 0 : i64, tpu.core_type = #tpu.core_type<tc>, window_params = [{transform_indices = @transform_0, window_bounds = array<i64: 16, 128>}, {pipeline_mode = #tpu.pipeline_mode<synchronous>, transform_indices = @transform_1, window_bounds = array<i64: 128, 128>}, {transform_indices = @transform_2, window_bounds = array<i64: 16, 128>}]} {
    %c0 = arith.constant 0 : index
    %c0_0 = arith.constant 0 : index
    %0 = vector.load %arg1[%c0, %c0_0] : memref<16x128xf32, #tpu.memory_space<vmem>>, vector<16x128xf32>
    %c0_1 = arith.constant 0 : index
    %c0_2 = arith.constant 0 : index
    %1 = vector.load %arg2[%c0_1, %c0_2] : memref<128x128xf32, #tpu.memory_space<vmem>>, vector<128x128xf32>
    %cst = arith.constant dense<0.000000e+00> : vector<16x128xf32>
    %2 = tpu.matmul %0, %1, %cst {dimension_numbers = #tpu.dot_dimension_numbers<[1], [1], [0], [0], [0, 0, 1, 0], [], []>} : vector<16x128xf32>, vector<128x128xf32>, vector<16x128xf32> -> vector<16x128xf32>
    %c0_3 = arith.constant 0 : index
    %c0_4 = arith.constant 0 : index
    %3 = vector.load %arg3[%c0_3, %c0_4] : memref<16x128xf32, #tpu.memory_space<vmem>>, vector<16x128xf32>
    tpu.vector_store %arg3[%c0_3, %c0_4], %2 {strides = array<i32>} : memref<16x128xf32, #tpu.memory_space<vmem>>, vector<16x128xf32>,
    return
  }
  func.func @transform_0(%arg0: i32) -> (i32, i32) {
    %c0_i32 = arith.constant 0 : i32
    %c0_i32_0 = arith.constant 0 : i32
    return %arg0, %c0_i32 : i32, i32
  }
  func.func @transform_1(%arg0: i32) -> (i32, i32) {
    %c0_i32 = arith.constant 0 : i32
    %c0_i32_0 = arith.constant 0 : i32
    %c0_i32_1 = arith.constant 0 : i32
    return %c0_i32, %c0_i32_0 : i32, i32
  }
  func.func @transform_2(%arg0: i32) -> (i32, i32) {
    %c0_i32 = arith.constant 0 : i32
    %c0_i32_0 = arith.constant 0 : i32
    return %arg0, %c0_i32 : i32, i32
  }
}

</mosaic_0001>

<bundles_post_ra>
// kernel: tpu_custom_call.1
= control target key start
LH: loop header
LB: loop body
LE: loop exit
PB: predicated region body
PF: predicated region fallthrough
CT: control target
= control target key end

     0   :  { %7 = vsyncpa [#allocation3], 0  ;;  %s244_s0 = inlined_call_operand.hbm [shape: f32[16,128], index: 0, kind: input, shape index: {}]   ;;  %s245_s1 = inlined_call_operand.hbm [shape: f32[128,128], index: 1, kind: input, shape index: {}]   ;;  %s246_s2 = inlined_call_operand.hbm [shape: f32[16,128], index: 2, kind: output, shape index: {}]  }
   0x1   :  { %8 = vsyncpa [#allocation6], 0 }
   0x2   :  { %9 = vsyncpa [#allocation4], 0  ;;  %s14_s11 = sshll.u32 %s244_s0, 4  ;;  %s206_s12 = smov [#allocation2]   ;;  %s15_s11 = int_to_ptr.hbm [resolvable:$true] %s14_s11 }
   0x3   :  { %s16_s13 = sshll.u32 %s206_s12, 4  ;;  %s27_s16 = sshll.u32 %s245_s1, 4  ;;  %s17_s13 = int_to_ptr.vmem [resolvable:$true] %s16_s13  ;;  %s28_s16 = int_to_ptr.hbm [resolvable:$true] %s27_s16 }
   0x4   :  { %s207_s17 = smov 128   ;;  %s208_s18 = smov 8  }
   0x5   :  { %22 = dma.hbm_to_vmem [thread:$0]  %s15_s11, 256, %s17_s13, [#allocation3], %s207_s17, %s207_s17, %s208_s18  }
   0x6   :  { %s209_s19 = smov [#allocation5]  }
   0x7   :  { %s29_s20 = sshll.u32 %s209_s19, 4  ;;  %s30_s20 = int_to_ptr.vmem [resolvable:$true] %s29_s20 }
   0x8   :  { %35 = dma.hbm_to_vmem [thread:$0]  %s28_s16, 2048, %s30_s20, [#allocation6], %s207_s17, %s207_s17, %s208_s18  }
   0x9   :  { %200 = dma.done.wait [#allocation3], 256  }
   0xa   :  { %201 = vsyncadd [#allocation3], 4294967040 }
   0xb   :  { %202 = dma.done.wait [#allocation6], 2048  }
   0xc   :  { %203 = vsyncadd [#allocation6], 4294965248  ;;  %v61_v0 = vld [vmem:[#allocation5 + $0x78] sm:$0xff]  ;;  %v60_v1 = vld [vmem:[#allocation5 + $0x70] sm:$0xff]  ;;  %s210_s0 = smov [#allocation7]   ;;  %s93_s23 = sshll.u32 %s246_s2, 4  ;;  %s94_s23 = int_to_ptr.hbm [resolvable:$true] %s93_s23 }
   0xd   :  { %62 = vmatpush.xpose.msra.mxu0 %v61_v0  ;;  %107 = vmatpush.xpose.msra.mxu1 %v61_v0  ;;  %v59_v2 = vld [vmem:[#allocation5 + $0x68] sm:$0xff]  ;;  %v58_v3 = vld [vmem:[#allocation5 + $0x60] sm:$0xff]  ;;  %v57_v4 = vld [vmem:[#allocation5 + $0x58] sm:$0xff]  ;;  %s91_s1 = sshll.u32 %s210_s0, 4  ;;  %s92_s1 = int_to_ptr.vmem [resolvable:$true] %s91_s1 }
   0xe   :  { %v56_v5 = vld [vmem:[#allocation5 + $0x50] sm:$0xff]  ;;  %v55_v6 = vld [vmem:[#allocation5 + $0x48] sm:$0xff]  ;;  %v54_v7 = vld [vmem:[#allocation5 + $0x40] sm:$0xff] }
   0xf   :  { %v53_v8 = vld [vmem:[#allocation5 + $0x38] sm:$0xff]  ;;  %v52_v9 = vld [vmem:[#allocation5 + $0x30] sm:$0xff]  ;;  %v51_v10 = vld [vmem:[#allocation5 + $0x28] sm:$0xff] }
  0x10   :  { %v50_v11 = vld [vmem:[#allocation5 + $0x20] sm:$0xff]  ;;  %v49_v12 = vld [vmem:[#allocation5 + $0x18] sm:$0xff]  ;;  %v48_v13 = vld [vmem:[#allocation5 + $0x10] sm:$0xff] }
  0x11   :  { %63 = vmatpush.xpose.msra.mxu0 %v60_v1  ;;  %108 = vmatpush.xpose.msra.mxu1 %v60_v1  ;;  %v47_v14 = vld [vmem:[#allocation5 + $0x8] sm:$0xff]  ;;  %v46_v15 = vld [vmem:[#allocation5] sm:$0xff]  ;;  %v44_v16 = vld [vmem:[#allocation2] sm:$0xff] }
  0x12   :  { %v45_v17 = vld [vmem:[#allocation2 + $0x8] sm:$0xff] }
  0x15   :  { %64 = vmatpush.xpose.msra.mxu0 %v59_v2  ;;  %109 = vmatpush.xpose.msra.mxu1 %v59_v2 }
  0x19   :  { %65 = vmatpush.xpose.msra.mxu0 %v58_v3  ;;  %110 = vmatpush.xpose.msra.mxu1 %v58_v3 }
  0x1d   :  { %66 = vmatpush.xpose.msra.mxu0 %v57_v4  ;;  %111 = vmatpush.xpose.msra.mxu1 %v57_v4 }
  0x21   :  { %67 = vmatpush.xpose.msra.mxu0 %v56_v5  ;;  %112 = vmatpush.xpose.msra.mxu1 %v56_v5 }
  0x25   :  { %68 = vmatpush.xpose.msra.mxu0 %v55_v6  ;;  %113 = vmatpush.xpose.msra.mxu1 %v55_v6 }
  0x29   :  { %69 = vmatpush.xpose.msra.mxu0 %v54_v7  ;;  %114 = vmatpush.xpose.msra.mxu1 %v54_v7 }
  0x2d   :  { %70 = vmatpush.xpose.msra.mxu0 %v53_v8  ;;  %115 = vmatpush.xpose.msra.mxu1 %v53_v8 }
  0x31   :  { %71 = vmatpush.xpose.msra.mxu0 %v52_v9  ;;  %116 = vmatpush.xpose.msra.mxu1 %v52_v9 }
  0x35   :  { %72 = vmatpush.xpose.msra.mxu0 %v51_v10  ;;  %117 = vmatpush.xpose.msra.mxu1 %v51_v10 }
  0x39   :  { %73 = vmatpush.xpose.msra.mxu0 %v50_v11  ;;  %118 = vmatpush.xpose.msra.mxu1 %v50_v11 }
  0x3d   :  { %74 = vmatpush.xpose.msra.mxu0 %v49_v12  ;;  %119 = vmatpush.xpose.msra.mxu1 %v49_v12 }
  0x41   :  { %75 = vmatpush.xpose.msra.mxu0 %v48_v13  ;;  %120 = vmatpush.xpose.msra.mxu1 %v48_v13 }
  0x45   :  { %76 = vmatpush.xpose.msra.mxu0 %v47_v14  ;;  %121 = vmatpush.xpose.msra.mxu1 %v47_v14 }
  0x49   :  { %77 = vmatpush.xpose.msra.mxu0 %v46_v15  ;;  %122 = vmatpush.xpose.msra.mxu1 %v46_v15 }
  0x4c   :  { %78 = vmatmul.f32.vlgmr.msra.gmra.mxu0 %v44_v16  ;;  %81 = vmatmul.f32.vlgmr.msra.gmra.mxu1 %v45_v17 }
  0xc9   :  { %v79_v18 = vpop.f32.mrf.mxu0  ;;  %v82_v19 = vpop.f32.mrf.mxu1 }
  0xca   :  { %85 = vst [vmem:[#allocation7] sm:$0xff] %v79_v18 }
  0xcb   :  { %86 = vst [vmem:[#allocation7 + $0x8] sm:$0xff] %v82_v19 }
  0xcc   :  { %99 = dma.vmem_to_hbm [thread:$0]  %s92_s1, 256, %s94_s23, [#allocation4], %s207_s17, %s207_s17, %s208_s18  }
  0xcd   :  { %204 = dma.done.wait [#allocation4], 256  }
  0xce   :  { %205 = vsyncadd [#allocation4], 4294967040 }
  0xcf   :  { %104 = vsyncpa [#allocation3], 1 }
  0xd0   :  { %105 = vsyncpa [#allocation6], 1 }
  0xd1   :  { %106 = vsyncpa [#allocation4], 1 }

</bundles_post_ra>
